<compile_context>
chip_gen: v6e
topology: v6e:2x2x1
jax: 0.10.0
libtpu: 0.0.40
codegen_flags: <defaults>
</compile_context>

<pallas_src>
import jax
import jax.numpy as jnp
import numpy as np
from jax.experimental import pallas as pl
from jax.experimental.pallas import tpu as pltpu

# ---------------- problem sizes (small, consistent with the module) ----------
B = 2                # batch
IMG_CHANNELS = 4     # > 3, so conv1 is the replaced Conv2d(img_channels, 64, 7, 2, 3)
H = W = 16
K = 7
STRIDE = 2
PAD = 3
STEM_CH = 64
R_SIZE = STEM_CH     # encoder feature size of the simplified encoder
Z_SIZE = 32
OH = (H + 2 * PAD - K) // STRIDE + 1   # 8
OW = (W + 2 * PAD - K) // STRIDE + 1   # 8
OHW = OH * OW                          # 64
CKK = IMG_CHANNELS * K * K             # 196
CKK_PAD = 256                          # contraction dim padded to a multiple of 128
Z_PAD = 128                            # projection lanes padded to 128


# ---------------- in-kernel exact erf (Eigen/XLA f32 rational approximation) --
def _erf_f32(x):
    # Matches torch's exact (erf-based) GELU to f32 precision; uses only
    # mul/add/div/clip so it always lowers on the VPU.
    x = jnp.clip(x, -4.0, 4.0)
    x2 = x * x
    a = jnp.float32(-2.72614225801306e-10)
    a = a * x2 + jnp.float32(2.77068142495902e-08)
    a = a * x2 + jnp.float32(-2.10102402082508e-06)
    a = a * x2 + jnp.float32(-5.69250639462346e-05)
    a = a * x2 + jnp.float32(-7.34990630326855e-04)
    a = a * x2 + jnp.float32(-2.95459980854025e-03)
    a = a * x2 + jnp.float32(-1.60960333262415e-02)
    a = a * x
    b = jnp.float32(-1.45660718464996e-05)
    b = b * x2 + jnp.float32(-2.13374055278905e-04)
    b = b * x2 + jnp.float32(-1.68282697438203e-03)
    b = b * x2 + jnp.float32(-7.37332916720468e-03)
    b = b * x2 + jnp.float32(-1.42647390514189e-02)
    return a / b


# ---------------- fused Pallas kernel -----------------------------------------
def supcon_kernel(patches_ref, wconv_ref, w1_ref, b1_ref, w2_ref, b2_ref,
                  r_ref, z_ref):
    """One grid step = one batch element. Fuses:
         conv1 (im2col matmul) -> ReLU -> global-avg-pool  ==> r
         Linear -> exact GELU -> Linear -> F.normalize     ==> z

    patches_ref: (1, OHW, CKK_PAD)   wconv_ref: (CKK_PAD, STEM_CH)
    w1_ref: (R_SIZE, Z_PAD)  b1_ref: (1, Z_PAD)
    w2_ref: (Z_PAD, Z_PAD)   b2_ref: (1, Z_PAD)
    r_ref:  (1, 1, STEM_CH)  z_ref:  (1, 1, Z_PAD)
    """
    p = patches_ref[0]                                         # (OHW, CKK_PAD)
    # Single MXU pass for the stem conv of this batch element.
    conv = jnp.dot(p, wconv_ref[...], preferred_element_type=jnp.float32)
    conv = jnp.maximum(conv, 0.0)                              # ReLU
    r = jnp.mean(conv, axis=0, keepdims=True)                  # (1, STEM_CH) GAP
    r_ref[0] = r

    # Projection head (all operands zero-padded to 128 lanes -> exact result).
    h = jnp.dot(r, w1_ref[...], preferred_element_type=jnp.float32) + b1_ref[...]
    h = 0.5 * h * (1.0 + _erf_f32(h * jnp.float32(0.70710678118654752)))  # exact GELU
    z = jnp.dot(h, w2_ref[...], preferred_element_type=jnp.float32) + b2_ref[...]
    # F.normalize(dim=1): z / max(||z||, 1e-12) == z * rsqrt(max(||z||^2, 1e-24)).
    # rsqrt goes to the EUP (its own VLIW slot), no VALU divide chain.
    ssq = jnp.sum(z * z, axis=1, keepdims=True)                # padded lanes are 0
    z_ref[0] = z * jax.lax.rsqrt(jnp.maximum(ssq, jnp.float32(1e-24)))


def supcon_pallas(patches, w_conv, w1p, b1p, w2p, b2p):
    return pl.pallas_call(
        supcon_kernel,
        out_shape=(jax.ShapeDtypeStruct((B, 1, STEM_CH), jnp.float32),
                   jax.ShapeDtypeStruct((B, 1, Z_PAD), jnp.float32)),
        grid=(B,),
        in_specs=[
            pl.BlockSpec((1, OHW, CKK_PAD), lambda b: (b, 0, 0)),
            pl.BlockSpec((CKK_PAD, STEM_CH), lambda b: (0, 0)),
            pl.BlockSpec((R_SIZE, Z_PAD), lambda b: (0, 0)),
            pl.BlockSpec((1, Z_PAD), lambda b: (0, 0)),
            pl.BlockSpec((Z_PAD, Z_PAD), lambda b: (0, 0)),
            pl.BlockSpec((1, Z_PAD), lambda b: (0, 0)),
        ],
        out_specs=(
            pl.BlockSpec((1, 1, STEM_CH), lambda b: (b, 0, 0)),
            pl.BlockSpec((1, 1, Z_PAD), lambda b: (b, 0, 0)),
        ),
        # Batch axis is independent -> parallel: lets Mosaic shard the two
        # grid steps across the two TensorCores on v7x (no-op on v5e/v6e).
        compiler_params=pltpu.CompilerParams(
            dimension_semantics=("parallel",)),
    )(patches, w_conv, w1p, b1p, w2p, b2p)


@jax.jit
def supcon_forward(x, conv_w, w1, b1, w2, b2):
    """Returns (r, z) like SupConNet.forward."""
    # im2col via XLA's patch extractor: output channel ordering is
    # (c, ki, kj) row-major, matching conv_w.reshape(O, C*K*K).
    patches = jax.lax.conv_general_dilated_patches(
        x, (K, K), (STRIDE, STRIDE), ((PAD, PAD), (PAD, PAD)),
        dimension_numbers=("NCHW", "OIHW", "NHWC"))          # (B, OH, OW, CKK)
    patches = patches.reshape(B, OHW, CKK)
    patches = jnp.pad(patches, ((0, 0), (0, 0), (0, CKK_PAD - CKK)))

    w_conv = conv_w.reshape(STEM_CH, CKK).T                   # (CKK, STEM_CH)
    w_conv = jnp.pad(w_conv, ((0, CKK_PAD - CKK), (0, 0)))    # (256, 64)

    # Projection params, zero-padded to lane-dense (…,128) shapes.
    w1p = jnp.pad(w1.T, ((0, 0), (0, Z_PAD - R_SIZE)))        # (64, 128)
    b1p = jnp.pad(b1.reshape(1, -1), ((0, 0), (0, Z_PAD - R_SIZE)))
    w2p = jnp.pad(w2.T, ((0, Z_PAD - R_SIZE), (0, Z_PAD - Z_SIZE)))  # (128, 128)
    b2p = jnp.pad(b2.reshape(1, -1), ((0, 0), (0, Z_PAD - Z_SIZE)))

    r3, z3 = supcon_pallas(patches, w_conv, w1p, b1p, w2p, b2p)
    r = r3.reshape(B, STEM_CH)
    z = z3.reshape(B, Z_PAD)[:, :Z_SIZE]
    return r, z


# ---------------- plain-JAX reference (for verification) ----------------------
def reference(x, conv_w, w1, b1, w2, b2):
    conv = jax.lax.conv_general_dilated(
        x, conv_w, window_strides=(STRIDE, STRIDE),
        padding=((PAD, PAD), (PAD, PAD)),
        dimension_numbers=("NCHW", "OIHW", "NCHW"))
    feat = jnp.maximum(conv, 0.0)
    r = jnp.mean(feat, axis=(2, 3))
    h = r @ w1.T + b1
    h = 0.5 * h * (1.0 + jax.scipy.special.erf(h / jnp.sqrt(2.0)))
    z = h @ w2.T + b2
    nrm = jnp.sqrt(jnp.sum(z * z, axis=1, keepdims=True))
    return r, z / jnp.maximum(nrm, 1e-12)


# ---------------- main ---------------------------------------------------------
if __name__ == "__main__":
    key = jax.random.PRNGKey(0)
    k1, k2, k3, k4, k5, k6 = jax.random.split(key, 6)

    x = jax.random.normal(k1, (B, IMG_CHANNELS, H, W), jnp.float32)

    # conv1 weight (Kaiming-normal style), no bias
    fan_in = IMG_CHANNELS * K * K
    conv_w = jax.random.normal(k2, (STEM_CH, IMG_CHANNELS, K, K), jnp.float32) \
        * np.float32(np.sqrt(2.0 / fan_in))

    # projection head params, PyTorch nn.Linear default-style uniform init
    bound = np.float32(1.0 / np.sqrt(R_SIZE))
    w1 = jax.random.uniform(k3, (R_SIZE, R_SIZE), jnp.float32, -bound, bound)
    b1 = jax.random.uniform(k4, (R_SIZE,), jnp.float32, -bound, bound)
    w2 = jax.random.uniform(k5, (Z_SIZE, R_SIZE), jnp.float32, -bound, bound)
    b2 = jax.random.uniform(k6, (Z_SIZE,), jnp.float32, -bound, bound)

    r, z = supcon_forward(x, conv_w, w1, b1, w2, b2)
    r, z = jax.block_until_ready((r, z))

    r_ref, z_ref = reference(x, conv_w, w1, b1, w2, b2)
    np.testing.assert_allclose(np.asarray(r), np.asarray(r_ref), rtol=5e-3, atol=5e-3)
    np.testing.assert_allclose(np.asarray(z), np.asarray(z_ref), rtol=5e-3, atol=5e-3)

    print("KERNEL_OK")
</pallas_src>

<mosaic_0001>
module attributes {stable_mosaic.version = 11 : i64} {
  func.func @supcon_kernel(%arg0: i32, %arg1: memref<1x64x256xf32, #tpu.memory_space<vmem>>, %arg2: memref<256x64xf32, #tpu.memory_space<vmem>>, %arg3: memref<64x128xf32, #tpu.memory_space<vmem>>, %arg4: memref<1x128xf32, #tpu.memory_space<vmem>>, %arg5: memref<128x128xf32, #tpu.memory_space<vmem>>, %arg6: memref<1x128xf32, #tpu.memory_space<vmem>>, %arg7: memref<1x1x64xf32, #tpu.memory_space<vmem>>, %arg8: memref<1x1x128xf32, #tpu.memory_space<vmem>>) attributes {dimension_semantics = [#tpu.dimension_semantics<parallel>], iteration_bounds = array<i64: 2>, scalar_prefetch = 0 : i64, scratch_operands = 0 : i64, tpu.core_type = #tpu.core_type<tc>, window_params = [{transform_indices = @transform_0, window_bounds = array<i64: 1, 64, 256>}, {pipeline_mode = #tpu.pipeline_mode<synchronous>, transform_indices = @transform_1, window_bounds = array<i64: 256, 64>}, {pipeline_mode = #tpu.pipeline_mode<synchronous>, transform_indices = @transform_2, window_bounds = array<i64: 64, 128>}, {pipeline_mode = #tpu.pipeline_mode<synchronous>, transform_indices = @transform_3, window_bounds = array<i64: 1, 128>}, {pipeline_mode = #tpu.pipeline_mode<synchronous>, transform_indices = @transform_4, window_bounds = array<i64: 128, 128>}, {pipeline_mode = #tpu.pipeline_mode<synchronous>, transform_indices = @transform_5, window_bounds = array<i64: 1, 128>}, {transform_indices = @transform_6, window_bounds = array<i64: 1, 1, 64>}, {transform_indices = @transform_7, window_bounds = array<i64: 1, 1, 128>}]} {
    %c0 = arith.constant 0 : index
    %c0_0 = arith.constant 0 : index
    %c0_1 = arith.constant 0 : index
    %0 = vector.load %arg1[%c0, %c0_0, %c0_1] : memref<1x64x256xf32, #tpu.memory_space<vmem>>, vector<1x64x256xf32>
    %1 = vector.shape_cast %0 : vector<1x64x256xf32> to vector<64x256xf32>
    %c0_2 = arith.constant 0 : index
    %c0_3 = arith.constant 0 : index
    %2 = vector.load %arg2[%c0_2, %c0_3] : memref<256x64xf32, #tpu.memory_space<vmem>>, vector<256x64xf32>
    %cst = arith.constant dense<0.000000e+00> : vector<64x64xf32>
    %3 = tpu.matmul %1, %2, %cst {dimension_numbers = #tpu.dot_dimension_numbers<[1], [0], [0], [1], [0, 0, 1, 1], [], []>} : vector<64x256xf32>, vector<256x64xf32>, vector<64x64xf32> -> vector<64x64xf32>
    %cst_4 = arith.constant 0.000000e+00 : f32
    %4 = vector.broadcast %cst_4 : f32 to vector<64x64xf32>
    %5 = arith.maximumf %3, %4 : vector<64x64xf32>
    %cst_5 = arith.constant dense<0.000000e+00> : vector<64xf32>
    %6 = vector.multi_reduction <add>, %5, %cst_5 [0] : vector<64x64xf32> to vector<64xf32>
    %7 = vector.shape_cast %6 : vector<64xf32> to vector<1x64xf32>
    %cst_6 = arith.constant 6.400000e+01 : f32
    %8 = vector.broadcast %cst_6 : f32 to vector<1x64xf32>
    %9 = arith.divf %7, %8 : vector<1x64xf32>
    %c0_7 = arith.constant 0 : index
    %c0_8 = arith.constant 0 : index
    %c0_9 = arith.constant 0 : index
    %10 = vector.load %arg7[%c0_7, %c0_8, %c0_9] : memref<1x1x64xf32, #tpu.memory_space<vmem>>, vector<1x1x64xf32>
    %11 = vector.shape_cast %10 : vector<1x1x64xf32> to vector<1x64xf32>
    %12 = vector.shape_cast %9 : vector<1x64xf32> to vector<1x1x64xf32>
    tpu.vector_store %arg7[%c0_7, %c0_8, %c0_9], %12 {strides = array<i32>} : memref<1x1x64xf32, #tpu.memory_space<vmem>>, vector<1x1x64xf32>,
    %c0_10 = arith.constant 0 : index
    %c0_11 = arith.constant 0 : index
    %13 = vector.load %arg3[%c0_10, %c0_11] : memref<64x128xf32, #tpu.memory_space<vmem>>, vector<64x128xf32>
    %cst_12 = arith.constant dense<0.000000e+00> : vector<1x128xf32>
    %14 = tpu.matmul %9, %13, %cst_12 {dimension_numbers = #tpu.dot_dimension_numbers<[1], [0], [0], [1], [0, 0, 1, 1], [], []>} : vector<1x64xf32>, vector<64x128xf32>, vector<1x128xf32> -> vector<1x128xf32>
    %c0_13 = arith.constant 0 : index
    %c0_14 = arith.constant 0 : index
    %15 = vector.load %arg4[%c0_13, %c0_14] : memref<1x128xf32, #tpu.memory_space<vmem>>, vector<1x128xf32>
    %16 = arith.addf %14, %15 : vector<1x128xf32>
    %cst_15 = arith.constant 5.000000e-01 : f32
    %17 = vector.broadcast %cst_15 : f32 to vector<1x128xf32>
    %18 = arith.mulf %17, %16 : vector<1x128xf32>
    %cst_16 = arith.constant 0.707106769 : f32
    %19 = vector.broadcast %cst_16 : f32 to vector<1x128xf32>
    %20 = arith.mulf %16, %19 : vector<1x128xf32>
    %cst_17 = arith.constant -4.000000e+00 : f32
    %cst_18 = arith.constant 4.000000e+00 : f32
    %21 = vector.broadcast %cst_17 : f32 to vector<1x128xf32>
    %22 = arith.maximumf %21, %20 : vector<1x128xf32>
    %23 = vector.broadcast %cst_18 : f32 to vector<1x128xf32>
    %24 = arith.minimumf %23, %22 : vector<1x128xf32>
    %25 = arith.mulf %24, %24 : vector<1x128xf32>
    %cst_19 = arith.constant -2.72614237E-10 : f32
    %26 = vector.broadcast %cst_19 : f32 to vector<1x128xf32>
    %27 = arith.mulf %26, %25 : vector<1x128xf32>
    %cst_20 = arith.constant 2.77068146E-8 : f32
    %28 = vector.broadcast %cst_20 : f32 to vector<1x128xf32>
    %29 = arith.addf %27, %28 : vector<1x128xf32>
    %30 = arith.mulf %29, %25 : vector<1x128xf32>
    %cst_21 = arith.constant -2.10102394E-6 : f32
    %31 = vector.broadcast %cst_21 : f32 to vector<1x128xf32>
    %32 = arith.addf %30, %31 : vector<1x128xf32>
    %33 = arith.mulf %32, %25 : vector<1x128xf32>
    %cst_22 = arith.constant -5.69250624E-5 : f32
    %34 = vector.broadcast %cst_22 : f32 to vector<1x128xf32>
    %35 = arith.addf %33, %34 : vector<1x128xf32>
    %36 = arith.mulf %35, %25 : vector<1x128xf32>
    %cst_23 = arith.constant -7.34990637E-4 : f32
    %37 = vector.broadcast %cst_23 : f32 to vector<1x128xf32>
    %38 = arith.addf %36, %37 : vector<1x128xf32>
    %39 = arith.mulf %38, %25 : vector<1x128xf32>
    %cst_24 = arith.constant -2.954600e-03 : f32
    %40 = vector.broadcast %cst_24 : f32 to vector<1x128xf32>
    %41 = arith.addf %39, %40 : vector<1x128xf32>
    %42 = arith.mulf %41, %25 : vector<1x128xf32>
    %cst_25 = arith.constant -0.0160960332 : f32
    %43 = vector.broadcast %cst_25 : f32 to vector<1x128xf32>
    %44 = arith.addf %42, %43 : vector<1x128xf32>
    %45 = arith.mulf %44, %24 : vector<1x128xf32>
    %cst_26 = arith.constant -1.45660715E-5 : f32
    %46 = vector.broadcast %cst_26 : f32 to vector<1x128xf32>
    %47 = arith.mulf %46, %25 : vector<1x128xf32>
    %cst_27 = arith.constant -2.13374049E-4 : f32
    %48 = vector.broadcast %cst_27 : f32 to vector<1x128xf32>
    %49 = arith.addf %47, %48 : vector<1x128xf32>
    %50 = arith.mulf %49, %25 : vector<1x128xf32>
    %cst_28 = arith.constant -0.00168282702 : f32
    %51 = vector.broadcast %cst_28 : f32 to vector<1x128xf32>
    %52 = arith.addf %50, %51 : vector<1x128xf32>
    %53 = arith.mulf %52, %25 : vector<1x128xf32>
    %cst_29 = arith.constant -0.00737332925 : f32
    %54 = vector.broadcast %cst_29 : f32 to vector<1x128xf32>
    %55 = arith.addf %53, %54 : vector<1x128xf32>
    %56 = arith.mulf %55, %25 : vector<1x128xf32>
    %cst_30 = arith.constant -0.0142647391 : f32
    %57 = vector.broadcast %cst_30 : f32 to vector<1x128xf32>
    %58 = arith.addf %56, %57 : vector<1x128xf32>
    %59 = arith.divf %45, %58 : vector<1x128xf32>
    %cst_31 = arith.constant 1.000000e+00 : f32
    %60 = vector.broadcast %cst_31 : f32 to vector<1x128xf32>
    %61 = arith.addf %60, %59 : vector<1x128xf32>
    %62 = arith.mulf %18, %61 : vector<1x128xf32>
    %c0_32 = arith.constant 0 : index
    %c0_33 = arith.constant 0 : index
    %63 = vector.load %arg5[%c0_32, %c0_33] : memref<128x128xf32, #tpu.memory_space<vmem>>, vector<128x128xf32>
    %cst_34 = arith.constant dense<0.000000e+00> : vector<1x128xf32>
    %64 = tpu.matmul %62, %63, %cst_34 {dimension_numbers = #tpu.dot_dimension_numbers<[1], [0], [0], [1], [0, 0, 1, 1], [], []>} : vector<1x128xf32>, vector<128x128xf32>, vector<1x128xf32> -> vector<1x128xf32>
    %c0_35 = arith.constant 0 : index
    %c0_36 = arith.constant 0 : index
    %65 = vector.load %arg6[%c0_35, %c0_36] : memref<1x128xf32, #tpu.memory_space<vmem>>, vector<1x128xf32>
    %66 = arith.addf %64, %65 : vector<1x128xf32>
    %67 = arith.mulf %66, %66 : vector<1x128xf32>
    %cst_37 = arith.constant dense<0.000000e+00> : vector<1xf32>
    %68 = vector.multi_reduction <add>, %67, %cst_37 [1] : vector<1x128xf32> to vector<1xf32>
    %69 = vector.shape_cast %68 : vector<1xf32> to vector<1x1xf32>
    %cst_38 = arith.constant 1.000000e-24 : f32
    %70 = vector.broadcast %cst_38 : f32 to vector<1x1xf32>
    %71 = arith.maximumf %69, %70 : vector<1x1xf32>
    %72 = math.rsqrt %71 : vector<1x1xf32>
    %73 = vector.broadcast %72 : vector<1x1xf32> to vector<1x128xf32>
    %74 = arith.mulf %66, %73 : vector<1x128xf32>
    %c0_39 = arith.constant 0 : index
    %c0_40 = arith.constant 0 : index
    %c0_41 = arith.constant 0 : index
    %75 = vector.load %arg8[%c0_39, %c0_40, %c0_41] : memref<1x1x128xf32, #tpu.memory_space<vmem>>, vector<1x1x128xf32>
    %76 = vector.shape_cast %75 : vector<1x1x128xf32> to vector<1x128xf32>
    %77 = vector.shape_cast %74 : vector<1x128xf32> to vector<1x1x128xf32>
    tpu.vector_store %arg8[%c0_39, %c0_40, %c0_41], %77 {strides = array<i32>} : memref<1x1x128xf32, #tpu.memory_space<vmem>>, vector<1x1x128xf32>,
    return
  }
  func.func @transform_0(%arg0: i32) -> (i32, i32, i32) {
    %c0_i32 = arith.constant 0 : i32
    %c0_i32_0 = arith.constant 0 : i32
    %c0_i32_1 = arith.constant 0 : i32
    return %arg0, %c0_i32, %c0_i32_0 : i32, i32, i32
  }
  func.func @transform_1(%arg0: i32) -> (i32, i32) {
    %c0_i32 = arith.constant 0 : i32
    %c0_i32_0 = arith.constant 0 : i32
    %c0_i32_1 = arith.constant 0 : i32
    return %c0_i32, %c0_i32_0 : i32, i32
  }
  func.func @transform_2(%arg0: i32) -> (i32, i32) {
    %c0_i32 = arith.constant 0 : i32
    %c0_i32_0 = arith.constant 0 : i32
    %c0_i32_1 = arith.constant 0 : i32
    return %c0_i32, %c0_i32_0 : i32, i32
  }
  func.func @transform_3(%arg0: i32) -> (i32, i32) {
    %c0_i32 = arith.constant 0 : i32
    %c0_i32_0 = arith.constant 0 : i32
    %c0_i32_1 = arith.constant 0 : i32
    return %c0_i32, %c0_i32_0 : i32, i32
  }
  func.func @transform_4(%arg0: i32) -> (i32, i32) {
    %c0_i32 = arith.constant 0 : i32
    %c0_i32_0 = arith.constant 0 : i32
    %c0_i32_1 = arith.constant 0 : i32
    return %c0_i32, %c0_i32_0 : i32, i32
  }
  func.func @transform_5(%arg0: i32) -> (i32, i32) {
    %c0_i32 = arith.constant 0 : i32
    %c0_i32_0 = arith.constant 0 : i32
    %c0_i32_1 = arith.constant 0 : i32
    return %c0_i32, %c0_i32_0 : i32, i32
  }
  func.func @transform_6(%arg0: i32) -> (i32, i32, i32) {
    %c0_i32 = arith.constant 0 : i32
    %c0_i32_0 = arith.constant 0 : i32
    %c0_i32_1 = arith.constant 0 : i32
    return %arg0, %c0_i32, %c0_i32_0 : i32, i32, i32
  }
  func.func @transform_7(%arg0: i32) -> (i32, i32, i32) {
    %c0_i32 = arith.constant 0 : i32
    %c0_i32_0 = arith.constant 0 : i32
    %c0_i32_1 = arith.constant 0 : i32
    return %arg0, %c0_i32, %c0_i32_0 : i32, i32, i32
  }
}

</mosaic_0001>

<bundles_post_ra>
// kernel: supcon_forward.1
= control target key start
LH: loop header
LB: loop body
LE: loop exit
PB: predicated region body
PF: predicated region fallthrough
CT: control target
= control target key end

     0   :  { %13 = vsyncpa [#allocation3], 0  ;;  %s1474_s0 = inlined_call_operand.vmem [shape: f32[2,64,256], index: 0, kind: input, shape index: {}]   ;;  %s1475_s1 = inlined_call_operand.vmem [shape: f32[256,64], index: 1, kind: input, shape index: {}]   ;;  %s1476_s2 = inlined_call_operand.vmem [shape: f32[64,128], index: 2, kind: input, shape index: {}]   ;;  %s1477_s3 = inlined_call_operand.vmem [shape: f32[1,128], index: 3, kind: input, shape index: {}]   ;;  %s1478_s4 = inlined_call_operand.vmem [shape: f32[128,128], index: 4, kind: input, shape index: {}]   ;;  %s1479_s5 = inlined_call_operand.vmem [shape: f32[1,128], index: 5, kind: input, shape index: {}]   ;;  %s1480_s6 = inlined_call_operand.hbm [shape: f32[2,1,64], index: 6, kind: output, shape index: {0}]   ;;  %s1481_s7 = inlined_call_operand.hbm [shape: f32[2,1,128], index: 7, kind: output, shape index: {1}]  }
   0x1   :  { %15 = vsyncpa [#allocation3 + $0x1], 0 }
   0x2   :  { %16 = vsyncpa [#allocation5], 0 }
   0x3   :  { %18 = vsyncpa [#allocation5 + $0x1], 0  ;;  %s1129_s24 = smov 0   ;;  %s1131_s25 = smov 0  }
   0x4   :  { %s1133_s26 = smov 0   ;;  %s1135_s27 = smov 0  }
   0x5 LB: > { %s1150_s28 = sadd.s32 4294967295, %s1083_s27   ;;  %s794_s29 = sadd.s32 4294967294, %s1083_s27   ;;  %s1083_s27 = sphi %s1135_s27, %s1489_s27   ;;  %s1079_s26 = sphi %s1133_s26, %s1488_s26   ;;  %s1075_s25 = sphi %s1131_s25, %s1487_s25   ;;  %s1071_s24 = sphi %s1129_s24, %s1486_s24  }
   0x6   : > { %s1154_s30 = sadd.s32 1, %s1083_s27   ;;  %s162_s8 = sadd.s32 1, %s1079_s26 }
   0x7   : > { %s159_s9 = ssub.s32 %s1083_s27, %s1154_s30  ;;  %p172_p0 = scmp.ne.s32.totalorder %s1079_s26, %s1075_s25 }
   0x8   : > { %p160_p1 = scmp.eq.s32.totalorder %s159_s9, 0  ;;  %p173_p2 = scmp.eq.s32.totalorder %s1150_s28, 1 }
   0x9   : > { %p178_p3 = scmp.ne.s32.totalorder %s1075_s25, %s1071_s24  ;;  %p179_p4 = scmp.eq.s32.totalorder %s794_s29, 1 }
   0xa   : > { %s1165_s10 = scalar_select %p160_p1, %s1079_s26, %s162_s8  }
   0xb   : > { %p1167_p5 = por %p173_p2, %p172_p0  ;;  %p1171_p6 = por %p179_p4, %p178_p3 }
   0xc   : > { %p797_p7 = scmp.ge.s32.totalorder %s1083_s27, 1  ;;  %p246_p8 = scmp.lt.s32.totalorder %s1083_s27, 3 }
   0xe   : > { %p247_p9 = pnand %p797_p7, %p246_p8 }
   0xf   : > { %p281_p10 = scmp.lt.s32.totalorder (!%p247_p9), %s1150_s28, 1  ;;  %s1340_s17 = sand.u32 (!%p247_p9), 1, %s1075_s25  }
  0x10   : > { %250 = sbr.rel (%p247_p9) target bundleno = 902 (0x386), region = 44  ;;  %s274_s18 = scalar_lea.vmem (!%p247_p9), [#allocation2], %s1340_s17 }
  0x11   : > { %s1482_s19 = sshll.u32 (!%p247_p9), %s1150_s28, 4  ;;  %s698_s22 = sshll.u32 (!%p247_p9), %s274_s18, 4  ;;  %s699_s22 = int_to_ptr.vmem [resolvable:$true] %s698_s22 }
  0x12   : > { %s696_s21 = scalar_lea.hbm (!%p247_p9), %s1480_s6, %s1482_s19  ;;  %s993_s8 = scalar_lea.vmem (!%p247_p9), %s699_s22, 16 }
  0x13   : > { %p994_p11 = scmp.ne.s32.totalorder (!%p247_p9), %s699_s22, %s993_s8  ;;  %s1087_s9 = smov (!%p247_p9), [#allocation2]  }
  0x14   : > { %s997_s13 = sshll.u32 (!%p247_p9), %s1087_s9, 4  ;;  %s998_s13 = int_to_ptr.vmem [resolvable:$false] %s997_s13 }
  0x15   : > { %v333_v0 = vld [vmem:[%s1475_s1 + $0xf8] sm:$0xff]  ;;  %v332_v2 = vld [vmem:[%s1475_s1 + $0xf0] sm:$0xff]  ;;  %v331_v4 = vld [vmem:[%s1475_s1 + $0xe8] sm:$0xff]  ;;  %s282_s23 = scalar_select %p281_p10, %s1150_s28, 1  ;;  %v1085_v48 = vmov 0.0   ;;  %vm1086_vm0 = vmmov 0  }
  0x16   : > { %v317_v1 = vld [vmem:[%s1475_s1 + $0x78] sm:$0xff]  ;;  %807 = vmatprep.subr.mxu0 %v333_v0  ;;  %v316_v3 = vld [vmem:[%s1475_s1 + $0x70] sm:$0xff]  ;;  %v315_v5 = vld [vmem:[%s1475_s1 + $0x68] sm:$0xff]  ;;  %889 = vmatprep.subr.mxu1 %v1085_v48  ;;  %vm447_vm1 = vcmask 523264   ;;  %vm471_vm2 = vcmask 516096   ;;  %vm673_vm3 = vcmask 1040384   ;;  %p995_p12 = pnand %p994_p11, %p1167_p5  ;;  %p1000_p0 = scmp.lt.s32.totalorder %s699_s22, %s998_s13 }
  0x17   : > { %808 = vmatpush3.msra.mxu0 %v317_v1  ;;  %v330_v6 = vld [vmem:[%s1475_s1 + $0xe0] sm:$0xff]  ;;  %s806_s14 = sshll.u32 %s282_s23, 7  ;;  %v329_v8 = vld [vmem:[%s1475_s1 + $0xd8] sm:$0xff]  ;;  %v328_v10 = vld [vmem:[%s1475_s1 + $0xd0] sm:$0xff]  ;;  %905 = vmatprep.mubr.msk.f32.mxu1 %vm1086_vm0, %v1085_v48  ;;  %s682_s23 = scalar_lea.sflag [#allocation3], %s1340_s17 }
  0x18   : > { %809 = vmatprep.subr.mxu0 %v332_v2  ;;  %v314_v7 = vld [vmem:[%s1475_s1 + $0x60] sm:$0xff]  ;;  %v313_v9 = vld [vmem:[%s1475_s1 + $0x58] sm:$0xff]  ;;  %s1212_s29 = scalar_lea.vmem %s1474_s0, %s806_s14  ;;  %v312_v11 = vld [vmem:[%s1475_s1 + $0x50] sm:$0xff]  ;;  %p996_p13 = pneg %p995_p12 }
  0x19   : > { %810 = vmatpush3.msra.mxu0 %v316_v3  ;;  %v327_v12 = vld [vmem:[%s1475_s1 + $0xc8] sm:$0xff]  ;;  %v326_v15 = vld [vmem:[%s1475_s1 + $0xc0] sm:$0xff]  ;;  %v325_v17 = vld [vmem:[%s1475_s1 + $0xb8] sm:$0xff]  ;;  %s999_s15 = scalar_lea.vmem %s998_s13, 32 }
  0x1a   : > { %811 = vmatprep.subr.mxu0 %v331_v4  ;;  %v287_v13 = vld [vmem:[%s1212_s29 + $0x8] sm:$0xff]  ;;  %v310_v16 = vld [vmem:[%s1475_s1 + $0x40] sm:$0xff]  ;;  %v309_v18 = vld [vmem:[%s1475_s1 + $0x38] sm:$0xff]  ;;  %p1001_p1 = scmp.lt.s32.totalorder %s999_s15, %s993_s8 }
  0x1b   : > { %812 = vmatpush3.msra.mxu0 %v315_v5  ;;  %v311_v14 = vld [vmem:[%s1475_s1 + $0x48] sm:$0xff]  ;;  %398 = vmatprep.mubr.f32.mxu0 %v287_v13  ;;  %v324_v19 = vld [vmem:[%s1475_s1 + $0xb0] sm:$0xff]  ;;  %v322_v23 = vld [vmem:[%s1475_s1 + $0xa0] sm:$0xff] }
  0x1c   : > { %813 = vmatprep.subr.mxu0 %v330_v6  ;;  %v308_v20 = vld [vmem:[%s1475_s1 + $0x30] sm:$0xff]  ;;  %v323_v21 = vld [vmem:[%s1475_s1 + $0xa8] sm:$0xff]  ;;  %v306_v24 = vld [vmem:[%s1475_s1 + $0x20] sm:$0xff]  ;;  %p1002_p2 = por %p1001_p1, %p1000_p0 }
  0x1d   : > { %814 = vmatpush3.msra.mxu0 %v314_v7  ;;  %v307_v22 = vld [vmem:[%s1475_s1 + $0x28] sm:$0xff]  ;;  %v321_v25 = vld [vmem:[%s1475_s1 + $0x98] sm:$0xff]  ;;  %v320_v27 = vld [vmem:[%s1475_s1 + $0x90] sm:$0xff] }
  0x1e   : > { %815 = vmatprep.subr.mxu0 %v329_v8  ;;  %v305_v26 = vld [vmem:[%s1475_s1 + $0x18] sm:$0xff]  ;;  %v304_v28 = vld [vmem:[%s1475_s1 + $0x10] sm:$0xff]  ;;  %v319_v29 = vld [vmem:[%s1475_s1 + $0x88] sm:$0xff]  ;;  %p1003_p3 = pnand %p1002_p2, %p996_p13 }
  0x1f   : > { %816 = vmatpush3.msra.mxu0 %v313_v9  ;;  %v303_v30 = vld [vmem:[%s1475_s1 + $0x8] sm:$0xff]  ;;  %v318_v31 = vld [vmem:[%s1475_s1 + $0x80] sm:$0xff]  ;;  %v289_v34 = vld [vmem:[%s1212_s29 + $0x18] sm:$0xff] }
  0x20   : > { %817 = vmatprep.subr.mxu0 %v328_v10  ;;  %v302_v32 = vld [vmem:[%s1475_s1] sm:$0xff]  ;;  %v288_v35 = vld [vmem:[%s1212_s29 + $0x10] sm:$0xff]  ;;  %v291_v36 = vld [vmem:[%s1212_s29 + $0x28] sm:$0xff] }
  0x21   : > { %818 = vmatpush3.msra.mxu0 %v312_v11  ;;  %v286_v33 = vld [vmem:[%s1212_s29] sm:$0xff]  ;;  %v293_v38 = vld [vmem:[%s1212_s29 + $0x38] sm:$0xff]  ;;  %v292_v39 = vld [vmem:[%s1212_s29 + $0x30] sm:$0xff] }
  0x22   : > { %819 = vmatprep.subr.mxu0 %v327_v12  ;;  %v290_v37 = vld [vmem:[%s1212_s29 + $0x20] sm:$0xff]  ;;  %v295_v40 = vld [vmem:[%s1212_s29 + $0x48] sm:$0xff]  ;;  %v297_v42 = vld [vmem:[%s1212_s29 + $0x58] sm:$0xff] }
  0x23   : > { %820 = vmatpush3.msra.mxu0 %v311_v14  ;;  %v294_v41 = vld [vmem:[%s1212_s29 + $0x40] sm:$0xff]  ;;  %v296_v43 = vld [vmem:[%s1212_s29 + $0x50] sm:$0xff]  ;;  %v299_v44 = vld [vmem:[%s1212_s29 + $0x68] sm:$0xff] }
  0x24   : > { %821 = vmatprep.subr.mxu0 %v326_v15  ;;  %v298_v45 = vld [vmem:[%s1212_s29 + $0x60] sm:$0xff]  ;;  %v301_v46 = vld [vmem:[%s1212_s29 + $0x78] sm:$0xff]  ;;  %v300_v47 = vld [vmem:[%s1212_s29 + $0x70] sm:$0xff] }
  0x25   : > { %822 = vmatpush3.msra.mxu0 %v310_v16  ;;  %v480_v49 = vld [vmem:[%s1476_s2 + $0x38] sm:$0xff]  ;;  %v479_v50 = vld [vmem:[%s1476_s2 + $0x30] sm:$0xff]  ;;  %v478_v51 = vld [vmem:[%s1476_s2 + $0x28] sm:$0xff] }
  0x26   : > { %823 = vmatprep.subr.mxu0 %v325_v17  ;;  %890 = vmatpush3.msra.mxu1 %v480_v49  ;;  %v477_v52 = vld [vmem:[%s1476_s2 + $0x20] sm:$0xff]  ;;  %v476_v53 = vld [vmem:[%s1476_s2 + $0x18] sm:$0xff]  ;;  %v475_v54 = vld [vmem:[%s1476_s2 + $0x10] sm:$0xff] }
  0x27   : > { %824 = vmatpush3.msra.mxu0 %v309_v18  ;;  %891 = vmatprep.subr.mxu1 %v1085_v48  ;;  %v474_v55 = vld [vmem:[%s1476_s2 + $0x8] sm:$0xff]  ;;  %v473_v56 = vld [vmem:[%s1476_s2] sm:$0xff]  ;;  %v599_v49 = vld [vmem:[%s1478_s4 + $0x70] sm:$0xff] }
  0x28   : > { %825 = vmatprep.subr.mxu0 %v324_v19  ;;  %892 = vmatpush3.msra.mxu1 %v479_v50  ;;  %v598_v50 = vld [vmem:[%s1478_s4 + $0x68] sm:$0xff] }
  0x29   : > { %826 = vmatpush3.msra.mxu0 %v308_v20  ;;  %893 = vmatprep.subr.mxu1 %v1085_v48 }
  0x2a   : > { %827 = vmatprep.subr.mxu0 %v323_v21  ;;  %894 = vmatpush3.msra.mxu1 %v478_v51  ;;  %v597_v51 = vld [vmem:[%s1478_s4 + $0x60] sm:$0xff] }
  0x2b   : > { %828 = vmatpush3.msra.mxu0 %v307_v22  ;;  %895 = vmatprep.subr.mxu1 %v1085_v48 }
  0x2c   : > { %829 = vmatprep.subr.mxu0 %v322_v23  ;;  %896 = vmatpush3.msra.mxu1 %v477_v52  ;;  %v596_v52 = vld [vmem:[%s1478_s4 + $0x58] sm:$0xff] }
  0x2d   : > { %830 = vmatpush3.msra.mxu0 %v306_v24  ;;  %897 = vmatprep.subr.mxu1 %v1085_v48 }
  0x2e   : > { %831 = vmatprep.subr.mxu0 %v321_v25  ;;  %898 = vmatpush3.msra.mxu1 %v476_v53  ;;  %v595_v53 = vld [vmem:[%s1478_s4 + $0x50] sm:$0xff] }
  0x2f   : > { %832 = vmatpush3.msra.mxu0 %v305_v26  ;;  %899 = vmatprep.subr.mxu1 %v1085_v48 }
  0x30   : > { %833 = vmatprep.subr.mxu0 %v320_v27  ;;  %900 = vmatpush3.msra.mxu1 %v475_v54  ;;  %v594_v54 = vld [vmem:[%s1478_s4 + $0x48] sm:$0xff] }
  0x31   : > { %834 = vmatpush3.msra.mxu0 %v304_v28  ;;  %901 = vmatprep.subr.mxu1 %v1085_v48 }
  0x32   : > { %835 = vmatprep.subr.mxu0 %v319_v29  ;;  %902 = vmatpush3.msra.mxu1 %v474_v55  ;;  %v593_v55 = vld [vmem:[%s1478_s4 + $0x40] sm:$0xff] }
  0x33   : > { %836 = vmatpush3.msra.mxu0 %v303_v30  ;;  %903 = vmatprep.subr.mxu1 %v1085_v48 }
  0x34   : > { %837 = vmatprep.subr.mxu0 %v318_v31  ;;  %904 = vmatpush3.msra.mxu1 %v473_v56  ;;  %v592_v56 = vld [vmem:[%s1478_s4 + $0x38] sm:$0xff] }
  0x35   : > { %838 = vmatpush3.msra.mxu0 %v302_v32  ;;  %908 = vmatprep.subr.mxu1 %v1085_v48 }
  0x36   : > { %399 = vmatmul.mubr.f32.vlgmr.msra.gmra.mxu0 %v286_v33 }
  0x37   : > { %403 = vmatprep.mubr.f32.mxu0 %v289_v34 }
  0x3a   : > { %404 = vmatmul.mubr.f32.gmra.mxu0 %v288_v35 }
  0x3b   : > { %408 = vmatprep.mubr.f32.mxu0 %v291_v36 }
  0x3e   : > { %409 = vmatmul.mubr.f32.gmra.mxu0 %v290_v37 }
  0x3f   : > { %413 = vmatprep.mubr.f32.mxu0 %v293_v38 }
  0x42   : > { %414 = vmatmul.mubr.f32.gmra.mxu0 %v292_v39 }
  0x43   : > { %418 = vmatprep.mubr.f32.mxu0 %v295_v40 }
  0x46   : > { %419 = vmatmul.mubr.f32.gmra.mxu0 %v294_v41 }
  0x47   : > { %423 = vmatprep.mubr.f32.mxu0 %v297_v42 }
  0x4a   : > { %424 = vmatmul.mubr.f32.gmra.mxu0 %v296_v43 }
  0x4b   : > { %428 = vmatprep.mubr.f32.mxu0 %v299_v44 }
  0x4e   : > { %429 = vmatmul.mubr.f32.gmra.mxu0 %v298_v45 }
  0x4f   : > { %433 = vmatprep.mubr.f32.mxu0 %v301_v46 }
  0x52   : > { %434 = vmatmul.mubr.f32.gmra.mxu0 %v300_v47  ;;  %v600_v47 = vld [vmem:[%s1478_s4 + $0x78] sm:$0xff] }
  0xf6   : > { %v839_v57 = vpop.f32.mrf.mxu0 }
  0xf8   : > { %v840_v58 = vpop.f32.mrf.mxu0 }
  0xf9   : > { %v841_v2 = vadd.f32 %v840_v58, %v839_v57  ;;  %v591_v57 = vld [vmem:[%s1478_s4 + $0x30] sm:$0xff]  ;;  %v590_v58 = vld [vmem:[%s1478_s4 + $0x28] sm:$0xff] }
  0xfa   : > { %v842_v59 = vpop.f32.mrf.mxu0 }
  0xfb   : > { %v439_v8 = vmax.f32 %v841_v2, 0.0 }
  0xfc   : > { %v843_v60 = vpop.f32.mrf.mxu0 }
  0xfd   : > { %v844_v0 = vadd.f32 %v843_v60, %v842_v59  ;;  %v448_v15 = vsel %vm447_vm1, %v439_v8, 0.0  ;;  %v589_v59 = vld [vmem:[%s1478_s4 + $0x20] sm:$0xff]  ;;  %v588_v60 = vld [vmem:[%s1478_s4 + $0x18] sm:$0xff] }
  0xfe   : > { %v845_v61 = vpop.f32.mrf.mxu0 }
  0xff   : > { %v440_v5 = vmax.f32 %v844_v0, 0.0  ;;  %v481_v0 = vld [vmem:[%s1477_s3] sm:$0x1] }
 0x100   : > { %v846_v62 = vpop.f32.mrf.mxu0 }
 0x101   : > { %v847_v3 = vadd.f32 %v846_v62, %v845_v61  ;;  %v449_v12 = vsel %vm447_vm1, %v440_v5, 0.0  ;;  %v587_v61 = vld [vmem:[%s1478_s4 + $0x10] sm:$0xff]  ;;  %v586_v62 = vld [vmem:[%s1478_s4 + $0x8] sm:$0xff] }
 0x102   : > { %v848_v63 = vpop.f32.mrf.mxu0  ;;  %v450_v19 = vadd.f32 %v449_v12, %v448_v15 }
 0x103   : > { %v441_v9 = vmax.f32 %v847_v3, 0.0 }
 0x104   : > { %v849_v1 = vpop.f32.mrf.mxu0 }
 0x105   : > { %v850_v6 = vadd.f32 %v849_v1, %v848_v63  ;;  %v451_v16 = vsel %vm447_vm1, %v441_v9, 0.0  ;;  %v585_v63 = vld [vmem:[%s1478_s4] sm:$0xff] }
 0x106   : > { %v851_v4 = vpop.f32.mrf.mxu0  ;;  %v452_v23 = vadd.f32 %v451_v16, %v450_v19 }
 0x107   : > { %v442_v13 = vmax.f32 %v850_v6, 0.0 }
 0x108   : > { %v852_v7 = vpop.f32.mrf.mxu0 }
 0x109   : > { %v853_v10 = vadd.f32 %v852_v7, %v851_v4  ;;  %v453_v21 = vsel %vm447_vm1, %v442_v13, 0.0 }
 0x10a   : > { %v854_v11 = vpop.f32.mrf.mxu0  ;;  %v454_v27 = vadd.f32 %v453_v21, %v452_v23 }
 0x10b   : > { %v443_v17 = vmax.f32 %v853_v10, 0.0 }
 0x10c   : > { %v855_v14 = vpop.f32.mrf.mxu0 }
 0x10d   : > { %v856_v18 = vadd.f32 %v855_v14, %v854_v11  ;;  %v455_v25 = vsel %vm447_vm1, %v443_v17, 0.0 }
 0x10e   : > { %v857_v20 = vpop.f32.mrf.mxu0  ;;  %v456_v31 = vadd.f32 %v455_v25, %v454_v27 }
 0x10f   : > { %v444_v22 = vmax.f32 %v856_v18, 0.0 }
 0x110   : > { %v858_v24 = vpop.f32.mrf.mxu0 }
 0x111   : > { %v859_v26 = vadd.f32 %v858_v24, %v857_v20  ;;  %v457_v29 = vsel %vm447_vm1, %v444_v22, 0.0 }
 0x112   : > { %v860_v28 = vpop.f32.mrf.mxu0  ;;  %v458_v35 = vadd.f32 %v457_v29, %v456_v31 }
 0x113   : > { %v445_v30 = vmax.f32 %v859_v26, 0.0 }
 0x114   : > { %v861_v32 = vpop.f32.mrf.mxu0 }
 0x115   : > { %v459_v33 = vsel %vm447_vm1, %v445_v30, 0.0  ;;  %v862_v34 = vadd.f32 %v861_v32, %v860_v28  ;;  %v601_v32 = vld [vmem:[%s1479_s5] sm:$0x1] }
 0x116   : > { %v460_v37 = vadd.f32 %v459_v33, %v458_v35 }
 0x117   : > { %v446_v36 = vmax.f32 %v862_v34, 0.0 }
 0x119   : > { %v461_v38 = vsel %vm447_vm1, %v446_v36, 0.0 }
 0x11a   : > { %v462_v39 = vadd.f32 %v461_v38, %v460_v37 }
 0x11c   : > { %v463_v40 = vrot.slane %v462_v39, 4 }
 0x11e   : > { %v464_v41 = vadd.f32 %v463_v40, %v462_v39 }
 0x120   : > { %v465_v42 = vrot.slane %v464_v41, 2 }
 0x122   : > { %v466_v43 = vadd.f32 %v465_v42, %v464_v41 }
 0x124   : > { %v467_v44 = vrot.slane %v466_v43, 1 }
 0x126   : > { %v468_v45 = vadd.f32 %v467_v44, %v466_v43 }
 0x128   : > { %v470_v46 = vmul.f32 0.015625, %v468_v45 }
 0x12a   : > { %906 = vmatmul.mubr.msk.f32.vlgmr.msra.gmra.mxu1 %vm447_vm1, %v470_v46  ;;  %472 = vst.msk [vmem:[%s274_s18] sm:$0x1] %vm471_vm2, %v470_v46 }
 0x12b   : > { %940 = vmatprep.mubr.msk.f32.mxu1 %vm1086_vm0, %v1085_v48  ;;  %909 = vmatpush3.msra.mxu1 %v600_v47 }
 0x12c   : > { %910 = vmatprep.subr.mxu1 %v1085_v48 }
 0x12d   : > { %911 = vmatpush3.msra.mxu1 %v599_v49 }
 0x12e   : > { %912 = vmatprep.subr.mxu1 %v1085_v48 }
 0x12f   : > { %913 = vmatpush3.msra.mxu1 %v598_v50 }
 0x130   : > { %914 = vmatprep.subr.mxu1 %v1085_v48 }
 0x131   : > { %915 = vmatpush3.msra.mxu1 %v597_v51 }
 0x132   : > { %916 = vmatprep.subr.mxu1 %v1085_v48 }
 0x133   : > { %917 = vmatpush3.msra.mxu1 %v596_v52 }
 0x134   : > { %918 = vmatprep.subr.mxu1 %v1085_v48 }
 0x135   : > { %919 = vmatpush3.msra.mxu1 %v595_v53 }
 0x136   : > { %920 = vmatprep.subr.mxu1 %v1085_v48 }
 0x137   : > { %921 = vmatpush3.msra.mxu1 %v594_v54 }
 0x138   : > { %922 = vmatprep.subr.mxu1 %v1085_v48 }
 0x139   : > { %923 = vmatpush3.msra.mxu1 %v593_v55 }
 0x13a   : > { %924 = vmatprep.subr.mxu1 %v1085_v48 }
 0x13b   : > { %925 = vmatpush3.msra.mxu1 %v592_v56 }
 0x13c   : > { %926 = vmatprep.subr.mxu1 %v1085_v48 }
 0x13d   : > { %927 = vmatpush3.msra.mxu1 %v591_v57 }
 0x13e   : > { %928 = vmatprep.subr.mxu1 %v1085_v48 }
 0x13f   : > { %929 = vmatpush3.msra.mxu1 %v590_v58 }
 0x140   : > { %930 = vmatprep.subr.mxu1 %v1085_v48 }
 0x141   : > { %931 = vmatpush3.msra.mxu1 %v589_v59 }
 0x142   : > { %932 = vmatprep.subr.mxu1 %v1085_v48 }
 0x143   : > { %933 = vmatpush3.msra.mxu1 %v588_v60 }
 0x144   : > { %934 = vmatprep.subr.mxu1 %v1085_v48 }
 0x145   : > { %935 = vmatpush3.msra.mxu1 %v587_v61 }
 0x146   : > { %936 = vmatprep.subr.mxu1 %v1085_v48 }
 0x147   : > { %937 = vmatpush3.msra.mxu1 %v586_v62 }
 0x148   : > { %938 = vmatprep.subr.mxu1 %v1085_v48 }
 0x149   : > { %939 = vmatpush3.msra.mxu1 %v585_v63 }
 0x1ea   : > { %v551_v1 = vpop.f32.mrf.mxu1 }
 0x1eb   : > { %v552_v2 = vadd.f32 %v551_v1, %v481_v0 }
 0x1ec   : > { %v907_v3 = vpop.f32.mrf.mxu1 }
 0x1ed   : > { %v556_v4 = vmul.f32 0.70710677, %v552_v2  ;;  %v555_v29 = vmul.f32 0.5, %v552_v2 }
 0x1ef   : > { %v801_v5 = vclamps-f32 %v556_v4, 4.0 }
 0x1f1   : > { %v559_v6 = vmul.f32 %v801_v5, %v801_v5 }
 0x1f3   : > { %v560_v7 = vmul.f32 -2.7261424e-10, %v559_v6  ;;  %v573_v8 = vmul.f32 -1.45660715e-05, %v559_v6 }
 0x1f5   : > { %v561_v9 = vadd.f32 2.7706815e-08, %v560_v7  ;;  %v574_v10 = vadd.f32 -0.00021337405, %v573_v8 }
 0x1f7   : > { %v562_v48 = vmul.f32 %v561_v9, %v559_v6  ;;  %v575_v11 = vmul.f32 %v574_v10, %v559_v6 }
 0x1f9   : > { %v563_v12 = vadd.f32 -2.101024e-06, %v562_v48  ;;  %v576_v13 = vadd.f32 -0.001682827, %v575_v11 }
 0x1fb   : > { %v564_v14 = vmul.f32 %v563_v12, %v559_v6  ;;  %v577_v15 = vmul.f32 %v576_v13, %v559_v6 }
 0x1fd   : > { %v565_v16 = vadd.f32 -5.6925062e-05, %v564_v14  ;;  %v578_v17 = vadd.f32 -0.0073733293, %v577_v15 }
 0x1ff   : > { %v566_v18 = vmul.f32 %v565_v16, %v559_v6  ;;  %v579_v19 = vmul.f32 %v578_v17, %v559_v6 }
 0x201   : > { %v567_v20 = vadd.f32 -0.00073499064, %v566_v18  ;;  %v580_v21 = vadd.f32 -0.014264739, %v579_v19 }
 0x203   : > { %v568_v22 = vmul.f32 %v567_v20, %v559_v6  ;;  %989 = vrcp.f32 %v580_v21 }
 0x205   : > { %v569_v23 = vadd.f32 -0.0029546, %v568_v22 }
 0x207   : > { %v570_v24 = vmul.f32 %v569_v23, %v559_v6 }
 0x209   : > { %v571_v25 = vadd.f32 -0.016096033, %v570_v24 }
 0x20b   : > { %v572_v26 = vmul.f32 %v801_v5, %v571_v25 }
 0x210   : > { %v990_v27 = vpop.eup %989 }
 0x211   : > { %v582_v28 = vmul.f32 %v990_v27, %v572_v26 }
 0x213   : > { %v583_v30 = vadd.f32 1.0, %v582_v28 }
 0x215   : > { %v584_v31 = vmul.f32 %v583_v30, %v555_v29 }
 0x217   : > { %941 = vmatmul.mubr.f32.vlgmr.msra.gmra.mxu1 %v584_v31 }
 0x2d7   : > { %v668_v33 = vpop.f32.mrf.mxu1 }
 0x2d8   : > { %v669_v34 = vadd.f32 %v668_v33, %v601_v32 }
 0x2d9   : > { %v942_v35 = vpop.f32.mrf.mxu1 }
 0x2da   : > { %v672_v36 = vmul.f32 %v669_v34, %v669_v34 }
 0x2dc   : > { %v674_v37 = vsel %vm673_vm3, %v672_v36, 0.0 }
 0x2dd   : > { %675 = vadd.xlane.f32.xlu0 %v674_v37 }
 0x2de   : > { %1006 = shalt.err (!%p1003_p3)
}
 0x2df   : > { %s1007_s16 = scalar_lea.hbm %s696_s21, 16  ;;  %s1011_s29 = scalar_lea.hbm %s1480_s6, 32 }
 0x2e0   : > { %p1008_p4 = scmp.ne.s32.totalorder %s696_s21, %s1007_s16  ;;  %p1012_p9 = scmp.lt.s32.totalorder %s696_s21, %s1480_s6 }
 0x2e1   : > { %p1013_p10 = scmp.lt.s32.totalorder %s1011_s29, %s1007_s16 }
 0x2e2   : > { %p1009_p7 = pnand %p1008_p4, %p1167_p5 }
 0x2e3   : > { %p1014_p11 = por %p1013_p10, %p1012_p9 }
 0x2e4   : > { %p1010_p8 = pneg %p1009_p7 }
 0x2e6   : > { %p1015_p12 = pnand %p1014_p11, %p1010_p8 }
 0x2e8   : > { %1018 = shalt.err (!%p1015_p12)
}
 0x2e9   : > { %943 = dma.vmem_to_hbm [thread:$0]  (%p1167_p5), %s699_s22, 16, %s696_s21, %s682_s23  }
 0x2ea   : > { %s280_s8 = scalar_lea.vmem [#allocation4], %s1340_s17  ;;  %s1485_s19 = sshll.u32 %s1150_s28, 4 }
 0x2eb   : > { %s711_s9 = sshll.u32 %s280_s8, 4  ;;  %s709_s16 = scalar_lea.hbm %s1481_s7, %s1485_s19  ;;  %s712_s9 = int_to_ptr.vmem [resolvable:$true] %s711_s9 }
 0x2ec   : > { %s686_s18 = scalar_lea.sflag [#allocation5], %s1340_s17  ;;  %s1019_s14 = scalar_lea.vmem %s712_s9, 16 }
 0x2ed   : > { %p1020_p13 = scmp.ne.s32.totalorder %s712_s9, %s1019_s14  ;;  %s1088_s21 = smov [#allocation4]  }
 0x2ee   : > { %s1023_s22 = sshll.u32 %s1088_s21, 4  ;;  %s1024_s22 = int_to_ptr.vmem [resolvable:$false] %s1023_s22 }
 0x2ef   : > { %p1021_p0 = pnand %p1020_p13, %p1167_p5  ;;  %s1025_s23 = scalar_lea.vmem %s1024_s22, 32 }
 0x2f0   : > { %p1026_p2 = scmp.lt.s32.totalorder %s712_s9, %s1024_s22  ;;  %p1027_p3 = scmp.lt.s32.totalorder %s1025_s23, %s1019_s14 }
 0x2f1   : > { %p1022_p1 = pneg %p1021_p0 }
 0x2f2   : > { %p1028_p4 = por %p1027_p3, %p1026_p2 }
 0x2f4   : > { %p1029_p7 = pnand %p1028_p4, %p1022_p1 }
 0x366   : > { %v676_v38 = vpop.xlane.xlu0 %675 }
 0x367   : > { %v677_v39 = vmax.f32 %v676_v38, 1e-24 }
 0x369   : > { %991 = vrsqrt.f32 %v677_v39 }
 0x376   : > { %v992_v40 = vpop.eup %991 }
 0x377   : > { %v679_v41 = vmul.f32 %v992_v40, %v669_v34 }
 0x379   : > { %680 = vst [vmem:[%s280_s8] sm:$0x1] %v679_v41 }
 0x37a   : > { %1032 = shalt.err (!%p1029_p7)
}
 0x37b   : > { %s1033_s28 = scalar_lea.hbm %s709_s16, 16  ;;  %s1037_s20 = scalar_lea.hbm %s1481_s7, 32 }
 0x37c   : > { %p1034_p8 = scmp.ne.s32.totalorder %s709_s16, %s1033_s28  ;;  %p1038_p11 = scmp.lt.s32.totalorder %s709_s16, %s1481_s7 }
 0x37d   : > { %p1039_p12 = scmp.lt.s32.totalorder %s1037_s20, %s1033_s28 }
 0x37e   : > { %p1035_p9 = pnand %p1034_p8, %p1167_p5 }
 0x37f   : > { %p1040_p13 = por %p1039_p12, %p1038_p11 }
 0x380   : > { %p1036_p10 = pneg %p1035_p9 }
 0x382   : > { %p1041_p0 = pnand %p1040_p13, %p1036_p10 }
 0x384   : > { %1044 = shalt.err (!%p1041_p0)
}
 0x385   : > { %944 = dma.vmem_to_hbm [thread:$0]  (%p1167_p5), %s712_s9, 16, %s709_s16, %s686_s18  }
 0x386 PF: > { %p954_p1 = scmp.ge.s32.totalorder %s1083_s27, 2  ;;  %s723_s13 = sand.u32 1, %s1071_s24  }
 0x387   : > { %s724_s15 = scalar_lea.sflag [#allocation3], %s723_s13 }
 0x388   : > { %p948_p2 = pnand %p954_p1, %p1171_p6 }
 0x38a   : > { %p949_p3 = pneg %p948_p2 }
 0x38c   : > { %1062 = dma.done.wait (%p949_p3), %s724_s15, 16  }
 0x38d   : > { %1064 = vsyncadd (%p949_p3), %s724_s15, 4294967280  ;;  %s732_s14 = scalar_lea.sflag [#allocation5], %s723_s13 }
 0x38e   : > { %1066 = dma.done.wait (%p949_p3), %s732_s14, 16  }
 0x38f   : > { %1068 = vsyncadd (%p949_p3), %s732_s14, 4294967280  ;;  %p21_p5 = scmp.ge.s32.totalorder %s1154_s30, 4   ;;  %s1486_s24 = smov %s1075_s25 }
 0x390   : > { %s1487_s25 = smov %s1079_s26  ;;  %s1488_s26 = smov %s1165_s10 }
 0x391   : > { %s1489_s27 = smov %s1154_s30  ;;  %23 = sbr.rel (!%p21_p5) target bundleno = 5 (0x5), region = 96 }
 0x396   :  { %736 = vsyncpa [#allocation3], 1 }
 0x397   :  { %738 = vsyncpa [#allocation3 + $0x1], 1 }
 0x398   :  { %739 = vsyncpa [#allocation5], 1 }
 0x399   :  { %741 = vsyncpa [#allocation5 + $0x1], 1 }

</bundles_post_ra>
